<compile_context>
chip_gen: v5e
topology: v5e:2x2
jax: 0.10.0
libtpu: 0.0.40
codegen_flags: <defaults>
</compile_context>

<pallas_src>
import jax
import jax.numpy as jnp
from jax import lax
from jax.experimental import pallas as pl
from jax.experimental.pallas import tpu as pltpu

NUM_ITERS = 200   # fixed projected-gradient iterations
UNROLL = 4        # manual unroll of the serial PG loop
assert NUM_ITERS % UNROLL == 0


# ----------------------------- Pass 1: ata = markers @ markers.T --------------------------------
def _ata_kernel(m_ref, ata_ref, acc_ref):
    g = pl.program_id(0)

    @pl.when(g == 0)
    def _init():
        acc_ref[...] = jnp.zeros_like(acc_ref)

    m = m_ref[...]  # (K, G_TILE) bf16
    acc_ref[...] += lax.dot_general(m, m, (((1,), (1,)), ((), ())),
                                    preferred_element_type=jnp.float32)

    @pl.when(g == pl.num_programs(0) - 1)
    def _store():
        ata_ref[...] = acc_ref[...]


# ----------------------------- Pass 2: fused atb accumulation + PG solve ------------------------
def _atb_pg_kernel(ata_ref, m_ref, st_ref, x_ref, acc_ref):
    g = pl.program_id(1)

    @pl.when(g == 0)
    def _init():
        acc_ref[...] = jnp.zeros_like(acc_ref)

    m = m_ref[...]    # (K, G_TILE)      bf16
    s = st_ref[...]   # (S_TILE, G_TILE) bf16
    acc_ref[...] += lax.dot_general(m, s, (((1,), (1,)), ((), ())),
                                    preferred_element_type=jnp.float32)

    @pl.when(g == pl.num_programs(1) - 1)
    def _solve():
        ata = ata_ref[...]            # (K, K)      f32
        atb = acc_ref[...]            # (K, S_TILE) f32
        k = ata.shape[0]

        # Step size 1/L, L >= lambda_max(ata) via the inf-norm bound (ata is PSD symmetric).
        row_sums = jnp.sum(jnp.abs(ata), axis=1, keepdims=True)      # (K, 1)
        lip = jnp.max(row_sums)
        alpha = 1.0 / (lip + 1e-12)

        # Fused update: x <- max(M @ x + c, 0)
        m_mat = jnp.eye(k, dtype=jnp.float32) - alpha * ata          # (K, K)
        c = alpha * atb                                              # (K, S_TILE)

        def body(_, x):
            for _u in range(UNROLL):  # manual unroll: overlap MXU pop with VPU max/add
                x = jnp.maximum(
                    jnp.dot(m_mat, x, preferred_element_type=jnp.float32) + c, 0.0)
            return x

        x = lax.fori_loop(0, NUM_ITERS // UNROLL, body, jnp.zeros_like(atb))  # (K, S_TILE)

        # Per-spot normalization (sum over cell types = sublane reduce), zero-column guarded.
        denom = jnp.maximum(jnp.sum(x, axis=0, keepdims=True), 1e-12)         # (1, S_TILE)
        x_ref[...] = (x / denom).astype(x_ref.dtype)                          # lane-dense (K, S_TILE)


# ----------------------------- Wrapper -----------------------------------------------------------
def nnls_forward(markers, st, *, s_tile=128, g_tile=256):
    K, G = markers.shape
    S, G2 = st.shape
    assert G == G2, "markers and st must share the gene axis"

    # Zero-pad cell types / genes / spots to tile multiples.
    # Padding is exact for the Gram products; padded spots/cell-types are sliced off at the end.
    k_pad = -(-K // 8) * 8
    g_pad = -(-G // g_tile) * g_tile
    s_pad = -(-S // s_tile) * s_tile
    m_bf = markers.astype(jnp.bfloat16)
    st_bf = st.astype(jnp.bfloat16)
    if (k_pad != K) or (g_pad != G):
        m_bf = jnp.pad(m_bf, ((0, k_pad - K), (0, g_pad - G)))
    if (s_pad != S) or (g_pad != G):
        st_bf = jnp.pad(st_bf, ((0, s_pad - S), (0, g_pad - G)))

    n_s = s_pad // s_tile
    n_g = g_pad // g_tile

    # Pass 1: ata (K, K), reduction over gene tiles.
    ata = pl.pallas_call(
        _ata_kernel,
        out_shape=jax.ShapeDtypeStruct((k_pad, k_pad), jnp.float32),
        grid=(n_g,),
        in_specs=[pl.BlockSpec((k_pad, g_tile), lambda j: (0, j))],
        out_specs=pl.BlockSpec((k_pad, k_pad), lambda j: (0, 0)),
        scratch_shapes=[pltpu.VMEM((k_pad, k_pad), jnp.float32)],
        compiler_params=pltpu.CompilerParams(dimension_semantics=("arbitrary",)),
    )(m_bf)

    # Pass 2: per spot tile -- accumulate atb over gene tiles in VMEM, then solve NNLS in place.
    x = pl.pallas_call(
        _atb_pg_kernel,
        out_shape=jax.ShapeDtypeStruct((k_pad, s_pad), jnp.float32),
        grid=(n_s, n_g),
        in_specs=[
            pl.BlockSpec((k_pad, k_pad), lambda i, j: (0, 0)),
            pl.BlockSpec((k_pad, g_tile), lambda i, j: (0, j)),
            pl.BlockSpec((s_tile, g_tile), lambda i, j: (i, j)),
        ],
        out_specs=pl.BlockSpec((k_pad, s_tile), lambda i, j: (0, i)),
        scratch_shapes=[pltpu.VMEM((k_pad, s_tile), jnp.float32)],
        compiler_params=pltpu.CompilerParams(
            dimension_semantics=("parallel", "arbitrary")),
    )(ata, m_bf, st_bf)

    # Lane-dense (K, S) in-kernel; final transpose + un-pad in XLA (cheap, outside the hot loop).
    return x.T[:S, :K]


# ----------------------------- Pure-JAX reference (same algorithm) -------------------------------
@jax.jit
def _nnls_reference(markers, st):
    m = markers.astype(jnp.bfloat16)
    s = st.astype(jnp.bfloat16)
    ata = jnp.dot(m, m.T, preferred_element_type=jnp.float32)
    atb = jnp.dot(m, s.T, preferred_element_type=jnp.float32)
    lip = jnp.max(jnp.sum(jnp.abs(ata), axis=1))
    alpha = 1.0 / (lip + 1e-12)
    m_mat = jnp.eye(markers.shape[0], dtype=jnp.float32) - alpha * ata
    c = alpha * atb

    def body(_, x):
        return jnp.maximum(jnp.dot(m_mat, x, preferred_element_type=jnp.float32) + c, 0.0)

    x = lax.fori_loop(0, NUM_ITERS, body, jnp.zeros_like(atb))
    w = x.T
    denom = jnp.maximum(jnp.sum(w, axis=1, keepdims=True), 1e-12)
    return w / denom


if __name__ == "__main__":
    # Small synthetic shapes implied by the module:
    #   K = 8 cell types, G = 512 genes, S = 256 spatial spots (exercises both tiled grids).
    K, G, S = 8, 512, 256
    key = jax.random.PRNGKey(0)
    k1, k2 = jax.random.split(key)
    # Non-negative expression-like data (keeps per-spot sums strictly positive).
    markers = jnp.abs(jax.random.normal(k1, (K, G), dtype=jnp.float32))
    st = jnp.abs(jax.random.normal(k2, (S, G), dtype=jnp.float32))

    W = jax.block_until_ready(nnls_forward(markers, st))

    assert W.shape == (S, K)
    assert W.dtype == jnp.float32
    assert bool(jnp.all(jnp.isfinite(W)))
    assert bool(jnp.all(W >= 0.0))
    assert bool(jnp.allclose(jnp.sum(W, axis=1), 1.0, atol=1e-4))

    W_ref = jax.block_until_ready(_nnls_reference(markers, st))
    assert float(jnp.max(jnp.abs(W - W_ref))) < 1e-2

    print("KERNEL_OK")
</pallas_src>

<mosaic_0001>
module attributes {stable_mosaic.version = 11 : i64} {
  func.func @_ata_kernel(%arg0: i32, %arg1: memref<8x256xbf16, #tpu.memory_space<vmem>>, %arg2: memref<8x8xf32, #tpu.memory_space<vmem>>, %arg3: memref<8x8xf32, #tpu.memory_space<vmem>>) attributes {dimension_semantics = [#tpu.dimension_semantics<arbitrary>], iteration_bounds = array<i64: 2>, scalar_prefetch = 0 : i64, scratch_operands = 1 : i64, tpu.core_type = #tpu.core_type<tc>, window_params = [{transform_indices = @transform_0, window_bounds = array<i64: 8, 256>}, {pipeline_mode = #tpu.pipeline_mode<synchronous>, transform_indices = @transform_1, window_bounds = array<i64: 8, 8>}]} {
    %c0_i32 = arith.constant 0 : i32
    %0 = arith.cmpi eq, %arg0, %c0_i32 : i32
    %1 = arith.extui %0 : i1 to i32
    %c0_i32_0 = arith.constant 0 : i32
    %2 = arith.cmpi ne, %1, %c0_i32_0 : i32
    scf.if %2 {
      %cst_7 = arith.constant 0.000000e+00 : f32
      %11 = vector.broadcast %cst_7 : f32 to vector<8x8xf32>
      %c0_8 = arith.constant 0 : index
      %c0_9 = arith.constant 0 : index
      %12 = vector.load %arg3[%c0_8, %c0_9] : memref<8x8xf32, #tpu.memory_space<vmem>>, vector<8x8xf32>
      tpu.vector_store %arg3[%c0_8, %c0_9], %11 {strides = array<i32>} : memref<8x8xf32, #tpu.memory_space<vmem>>, vector<8x8xf32>,
    } else {
    }
    %c0 = arith.constant 0 : index
    %c0_1 = arith.constant 0 : index
    %3 = vector.load %arg1[%c0, %c0_1] : memref<8x256xbf16, #tpu.memory_space<vmem>>, vector<8x256xbf16>
    %c0_2 = arith.constant 0 : index
    %c0_3 = arith.constant 0 : index
    %4 = vector.load %arg3[%c0_2, %c0_3] : memref<8x8xf32, #tpu.memory_space<vmem>>, vector<8x8xf32>
    %cst = arith.constant dense<0.000000e+00> : vector<8x8xf32>
    %5 = tpu.matmul %3, %3, %cst {dimension_numbers = #tpu.dot_dimension_numbers<[1], [1], [0], [0], [0, 0, 1, 0], [], []>} : vector<8x256xbf16>, vector<8x256xbf16>, vector<8x8xf32> -> vector<8x8xf32>
    %6 = arith.addf %4, %5 : vector<8x8xf32>
    %c0_4 = arith.constant 0 : index
    %c0_5 = arith.constant 0 : index
    %7 = vector.load %arg3[%c0_4, %c0_5] : memref<8x8xf32, #tpu.memory_space<vmem>>, vector<8x8xf32>
    tpu.vector_store %arg3[%c0_4, %c0_5], %6 {strides = array<i32>} : memref<8x8xf32, #tpu.memory_space<vmem>>, vector<8x8xf32>,
    %c1_i32 = arith.constant 1 : i32
    %8 = arith.cmpi eq, %arg0, %c1_i32 : i32
    %9 = arith.extui %8 : i1 to i32
    %c0_i32_6 = arith.constant 0 : i32
    %10 = arith.cmpi ne, %9, %c0_i32_6 : i32
    scf.if %10 {
      %c0_7 = arith.constant 0 : index
      %c0_8 = arith.constant 0 : index
      %11 = vector.load %arg3[%c0_7, %c0_8] : memref<8x8xf32, #tpu.memory_space<vmem>>, vector<8x8xf32>
      %c0_9 = arith.constant 0 : index
      %c0_10 = arith.constant 0 : index
      %12 = vector.load %arg2[%c0_9, %c0_10] : memref<8x8xf32, #tpu.memory_space<vmem>>, vector<8x8xf32>
      tpu.vector_store %arg2[%c0_9, %c0_10], %11 {strides = array<i32>} : memref<8x8xf32, #tpu.memory_space<vmem>>, vector<8x8xf32>,
    } else {
    }
    return
  }
  func.func @transform_0(%arg0: i32) -> (i32, i32) {
    %c0_i32 = arith.constant 0 : i32
    %c0_i32_0 = arith.constant 0 : i32
    return %c0_i32, %arg0 : i32, i32
  }
  func.func @transform_1(%arg0: i32) -> (i32, i32) {
    %c0_i32 = arith.constant 0 : i32
    %c0_i32_0 = arith.constant 0 : i32
    %c0_i32_1 = arith.constant 0 : i32
    return %c0_i32, %c0_i32_0 : i32, i32
  }
}

</mosaic_0001>

<bundles_post_ra>
// kernel: tpu_custom_call.1
= control target key start
LH: loop header
LB: loop body
LE: loop exit
PB: predicated region body
PF: predicated region fallthrough
CT: control target
= control target key end

     0   :  { %6 = vsyncpa [#allocation4], 0  ;;  %s501_s0 = inlined_call_operand.hbm [shape: bf16[8,512], index: 0, kind: input, shape index: {}]   ;;  %s502_s1 = inlined_call_operand.hbm [shape: f32[8,8], index: 1, kind: output, shape index: {}]  }
   0x1   :  { %8 = vsyncpa [#allocation4 + $0x1], 0 }
   0x2   :  { %9 = vsyncpa [#allocation5], 0  ;;  %s406_s6 = smov 0   ;;  %s408_s7 = smov 0  }
   0x3   :  { %s410_s8 = smov 0   ;;  %s412_s9 = smov 0  }
   0x4 LB: > { %s425_s10 = sadd.s32 4294967295, %s392_s9   ;;  %s428_s11 = sadd.s32 1, %s392_s9   ;;  %s392_s9 = sphi %s412_s9, %s509_s9   ;;  %s388_s8 = sphi %s410_s8, %s508_s8   ;;  %s384_s7 = sphi %s408_s7, %s507_s7   ;;  %s380_s6 = sphi %s406_s6, %s506_s6  }
   0x5   : > { %s19_s12 = ssub.s32 %s392_s9, %s428_s11  ;;  %s22_s13 = sadd.s32 1, %s388_s8 }
   0x6   : > { %p20_p0 = scmp.eq.s32.totalorder %s19_s12, 0  ;;  %p29_p1 = scmp.ne.s32.totalorder %s388_s8, %s384_s7 }
   0x7   : > { %p30_p2 = scmp.eq.s32.totalorder %s392_s9, 0  ;;  %p35_p3 = scmp.ne.s32.totalorder %s384_s7, %s380_s6 }
   0x8   : > { %s438_s14 = scalar_select %p20_p0, %s388_s8, %s22_s13  }
   0x9   : > { %p440_p4 = por %p30_p2, %p29_p1  ;;  %p36_p5 = scmp.eq.s32.totalorder %s425_s10, 0 }
   0xa   : > { %p259_p6 = scmp.lt.s32.totalorder %s392_s9, 2  ;;  %s80_s17 = sand.u32 1, %s388_s8  }
   0xb   : > { %p446_p7 = por %p36_p5, %p35_p3  ;;  %s237_s18 = sshll.u32 %s80_s17, 3 }
   0xc   : > { %s248_s19 = sshll.u32 %s392_s9, 3  ;;  %s84_s23 = scalar_lea.vmem [#allocation3], %s237_s18 }
   0xd   : > { %s89_s22 = scalar_lea.hbm %s501_s0, %s248_s19  ;;  %s93_s24 = sshll.u32 %s84_s23, 4  ;;  %s94_s24 = int_to_ptr.vmem [resolvable:$true] %s93_s24 }
   0xe   : > { %s91_s25 = sshll.u32 %s89_s22, 4  ;;  %p457_p8 = pnand %p259_p6, %p440_p4  ;;  %s92_s25 = int_to_ptr.hbm [resolvable:$true] %s91_s25 }
   0xf   : > { %p240_p9 = scmp.ge.s32.totalorder %s392_s9, 1  ;;  %p98_p10 = scmp.lt.s32.totalorder %s392_s9, 3 }
  0x10   : > { %s81_s27 = scalar_lea.sflag [#allocation4], %s80_s17  ;;  %s296_s28 = sshra.s32 %s92_s25, 4  ;;  %s297_s28 = int_to_ptr.hbm [resolvable:$true] %s296_s28 }
  0x11   : > { %s298_s29 = scalar_lea.hbm %s297_s28, 8  ;;  %p300_p12 = pneg %p457_p8 }
  0x12   : > { %p299_p11 = scmp.ne.s32.totalorder %s297_s28, %s298_s29  ;;  %s303_s3 = scalar_lea.hbm %s501_s0, 16 }
  0x13   : > { %p304_p1 = scmp.lt.s32.totalorder %s297_s28, %s501_s0  ;;  %p305_p2 = scmp.lt.s32.totalorder %s303_s3, %s298_s29 }
  0x14   : > { %p301_p13 = pnand %p300_p12, %p299_p11 }
  0x15   : > { %p306_p3 = por %p305_p2, %p304_p1 }
  0x16   : > { %p302_p0 = pneg %p301_p13 }
  0x18   : > { %p307_p4 = pnand %p306_p3, %p302_p0 }
  0x1a   : > { %310 = shalt.err (!%p307_p4)
}
  0x1b   : > { %258 = dma.hbm_to_vmem [thread:$0]  (!%p457_p8), %s92_s25, 128, %s94_s24, %s81_s27  }
  0x1c   : > { %p99_p5 = pnand %p240_p9, %p98_p10 }
  0x1d   : > { %s104_s6 = sand.u32 (!%p99_p5), 1, %s384_s7  }
  0x1e   : > { %102 = sbr.rel (%p99_p5) target bundleno = 201 (0xc9), region = 24  ;;  %s241_s12 = sshll.u32 (!%p99_p5), %s104_s6, 3 }
  0x1f   : > { %s105_s13 = scalar_lea.sflag (!%p99_p5), [#allocation4], %s104_s6  ;;  %s108_s15 = scalar_lea.vmem (!%p99_p5), [#allocation3], %s241_s12 }
  0x23   : > { %371 = dma.done.wait (%p446_p7), %s105_s13, 128  }
  0x24   : > { %373 = vsyncadd (%p446_p7), %s105_s13, 4294967168  ;;  %p242_p6 = scmp.ne.s32.totalorder %s425_s10, 0 }
  0x26   : > { %128 = sbr.rel (%p242_p6) target bundleno = 45 (0x2d), region = 32 }
  0x2b   : > { %vm129_vm0 = vcmask 64512   ;;  %v394_v0 = vmov 0.0  }
  0x2c   : > { %130 = vst.msk [vmem:[#allocation2] sm:$0xff] %vm129_vm0, %v394_v0 }
  0x2d PF: > { %v131_v1 = vld [vmem:[%s108_s15] sm:$0xff]  ;;  %vm167_vm1 = vcmask 64512   ;;  %p243_p7 = scmp.ne.s32.totalorder %s425_s10, 1 }
  0x2e   : > { %v134_v2 = vunpack.c.l.b16 %v131_v1  ;;  %v135_v3 = vunpack.c.h.b16 %v131_v1 }
  0x30   : > { %v136_v4 = vpack.c.b16 %v134_v2, %v134_v2  ;;  %v137_v5 = vpack.c.b16 %v135_v3, %v135_v3 }
  0x32   : > { %147 = vmatpush.bf16.xpose.msra.mxu0 %v136_v4  ;;  %160 = vmatpush.bf16.xpose.msra.mxu1 %v137_v5 }
  0x33   : > { %v132_v7 = vld [vmem:[#allocation2] sm:$0xff] }
  0x39   : > { %148 = vmatmul.bf16.vlgmr.msra.gmra.mxu0 %v136_v4  ;;  %161 = vmatmul.bf16.vlgmr.msra.gmra.mxu1 %v137_v5 }
  0xb6   : > { %v149_v6 = vpop.f32.mrf.mxu0  ;;  %v162_v8 = vpop.f32.mrf.mxu1 }
  0xb7   : > { %v163_v9 = vadd.f32 %v162_v8, %v149_v6 }
  0xb9   : > { %v166_v10 = vadd.f32 %v163_v9, %v132_v7 }
  0xba   : > { %172 = sbr.rel (%p243_p7) target bundleno = 196 (0xc4), region = 36 }
  0xbb   : > { %168 = vst.msk [vmem:[#allocation2] sm:$0xff] %vm167_vm1, %v166_v10 }
  0xbe   : > { %v151_v11 = vpop.f32.mrf.mxu0  ;;  %v164_v12 = vpop.f32.mrf.mxu1 }
  0xc2   : > { %v173_v13 = vld [vmem:[#allocation2] sm:$0xff] }
  0xc3   : > { %174 = vst.msk [vmem:[#allocation6] sm:$0xff] %vm167_vm1, %v173_v13 }
  0xc4 PF: > { %p260_p8 = scmp.eq.s32.totalorder %s425_s10, 1  ;;  %s395_s9 = smov [#allocation6]  }
  0xc5   : > { %s181_s16 = sshll.u32 %s395_s9, 4  ;;  %s183_s19 = sshll.u32 %s502_s1, 4  ;;  %s182_s16 = int_to_ptr.vmem [resolvable:$true] %s181_s16  ;;  %s184_s19 = int_to_ptr.hbm [resolvable:$true] %s183_s19 }
  0xc6   : > { %252 = dma.vmem_to_hbm [thread:$0]  (%p260_p8), %s182_s16, 128, %s184_s19, [#allocation5]  }
  0xc7   : > { %375 = dma.done.wait (%p260_p8), [#allocation5], 128  }
  0xc8   : > { %377 = vsyncadd (%p260_p8), [#allocation5], 4294967168 }
  0xc9 PF: > { %p12_p9 = scmp.ge.s32.totalorder %s428_s11, 4   ;;  %s506_s6 = smov %s384_s7 }
  0xca   : > { %s507_s7 = smov %s388_s8  ;;  %s508_s8 = smov %s438_s14 }
  0xcb   : > { %s509_s9 = smov %s428_s11  ;;  %14 = sbr.rel (!%p12_p9) target bundleno = 4 (0x4), region = 69 }
  0xd0   :  { %197 = vsyncpa [#allocation4], 1 }
  0xd1   :  { %199 = vsyncpa [#allocation4 + $0x1], 1 }
  0xd2   :  { %200 = vsyncpa [#allocation5], 1 }
  0xd3   :  { %202 = vsyncpa [#allocation5 + $0x1], 1 }

</bundles_post_ra>
